<compile_context>
chip_gen: v7x
topology: tpu7x:2x2x1
jax: 0.10.0
libtpu: 0.0.40
codegen_flags: <defaults>
</compile_context>

<pallas_src>
import functools

import jax
import jax.numpy as jnp
from jax.experimental import pallas as pl
from jax.experimental.pallas import tpu as pltpu


def _round_up(a, b):
    return (a + b - 1) // b * b


def _plan_tiles(num_nodes, tile_n=512, tile_k=1024):
    """Pick row / contraction tile sizes and padded dims for a graph of N nodes."""
    n = num_nodes
    tile_n = min(tile_n, _round_up(n, 8))
    if n > 8:
        # Keep >= 2 row tiles so the "parallel" row axis can be split across
        # TensorCores (v7x megacore).
        tile_n = min(tile_n, max(8, _round_up((n + 1) // 2, 8)))
    tile_k = min(tile_k, _round_up(n, 128))
    n_rows = _round_up(n, tile_n)   # padded output-node rows
    n_cols = _round_up(n, tile_k)   # padded contraction (neighbor) dim
    return tile_n, tile_k, n_rows, n_cols


def pagnn_kernel(adj_ref, rhs_ref, w_ref, b_ref, out_ref, acc_ref, rs_ref):
    """grid = (row tiles ["parallel"], contraction tiles ["arbitrary"])."""
    k = pl.program_id(1)
    f = acc_ref.shape[1] // 2        # padded F_in (lane-aligned split point)

    @pl.when(k == 0)
    def _init():
        acc_ref[...] = jnp.zeros_like(acc_ref)
        rs_ref[...] = jnp.zeros_like(rs_ref)

    adj = adj_ref[...]                                   # (tile_n, tile_k)

    # One fused MXU push: adj @ [mask*x | mask], lane-dense 2*F_in_p columns.
    acc_ref[...] += jnp.dot(adj, rhs_ref[...], preferred_element_type=jnp.float32)

    # adj @ ones_like(x) == row-sum of adj broadcast over features (XLU, not MXU).
    rs_ref[...] += jnp.sum(adj, axis=1, keepdims=True)

    @pl.when(k == pl.num_programs(1) - 1)
    def _finalize():
        acc = acc_ref[...]
        num = rs_ref[...] * acc[:, :f]                   # (adj @ 1) * (adj @ (mask*x))
        den = acc[:, f:]                                 # adj @ mask
        ratio = jnp.nan_to_num(num / den)
        out = jnp.dot(ratio, w_ref[...], preferred_element_type=jnp.float32) + b_ref[...]
        out_ref[...] = out.astype(out_ref.dtype)


@functools.partial(jax.jit, static_argnames=("tile_n", "tile_k"))
def pagnn_forward(adj, x, mask, weight, bias, *, tile_n=512, tile_k=1024):
    """adj: [N,N] or pre-padded [N_r,N_c]; x/mask: [N,F_in]; weight: [F_in,F_out];
    bias: [F_out]  ->  [N, F_out]."""
    N, F_in = x.shape
    F_out = weight.shape[1]

    tile_n, tile_k, N_r, N_c = _plan_tiles(N, tile_n, tile_k)
    F_in_p = _round_up(F_in, 64)      # 2*F_in_p is a multiple of 128 lanes
    F_out_p = _round_up(F_out, 128)   # lane-dense output

    # --- adjacency (pad only if not already built padded by the caller) ---------
    adj = adj.astype(jnp.float32)
    if adj.shape == (N_r, N_c):
        adj_p = adj
    else:
        adj_p = jnp.zeros((N_r, N_c), jnp.float32).at[:adj.shape[0], :adj.shape[1]].set(adj)

    # --- hoisted elementwise prep: rhs = [mask * nan_to_zero(x) | mask] ---------
    xf = x.astype(jnp.float32)
    mf = mask.astype(jnp.float32)
    x0 = jnp.where(jnp.isnan(xf), jnp.zeros_like(xf), xf)      # x[x.isnan()] = 0
    mx = jnp.pad(mf * x0, ((0, N_c - N), (0, F_in_p - F_in)))
    mm = jnp.pad(mf,      ((0, N_c - N), (0, F_in_p - F_in)))
    rhs_p = jnp.concatenate([mx, mm], axis=-1)                  # (N_c, 2*F_in_p)

    w_p = jnp.pad(weight.astype(jnp.float32),
                  ((0, F_in_p - F_in), (0, F_out_p - F_out)))
    b_p = jnp.pad(bias.astype(jnp.float32), (0, F_out_p - F_out)).reshape(1, F_out_p)

    grid = (N_r // tile_n, N_c // tile_k)

    # Explicit VMEM budget: double-buffered adj + rhs + out, grid-invariant w/b,
    # scratch accumulators.  Stays well under v5e 16 MiB scoped / v7x 64 MiB.
    vmem_need = 4 * (2 * tile_n * tile_k
                     + 2 * tile_k * (2 * F_in_p)
                     + 2 * tile_n * F_out_p
                     + 2 * (F_in_p * F_out_p + F_out_p)
                     + tile_n * (2 * F_in_p + 8))
    vmem_limit = int(min(max(2 * vmem_need, 32 << 20), 64 << 20))

    out_p = pl.pallas_call(
        pagnn_kernel,
        out_shape=jax.ShapeDtypeStruct((N_r, F_out_p), jnp.float32),
        grid_spec=pltpu.PrefetchScalarGridSpec(
            num_scalar_prefetch=0,
            grid=grid,
            in_specs=[
                pl.BlockSpec((tile_n, tile_k), lambda i, k: (i, k)),       # adj tile
                pl.BlockSpec((tile_k, 2 * F_in_p), lambda i, k: (k, 0)),   # fused rhs
                pl.BlockSpec((F_in_p, F_out_p), lambda i, k: (0, 0)),      # weight (invariant)
                pl.BlockSpec((1, F_out_p), lambda i, k: (0, 0)),           # bias (invariant)
            ],
            out_specs=pl.BlockSpec((tile_n, F_out_p), lambda i, k: (i, 0)),
            scratch_shapes=[
                pltpu.VMEM((tile_n, 2 * F_in_p), jnp.float32),  # [adj@(mask*x) | adj@mask]
                pltpu.VMEM((tile_n, 1), jnp.float32),           # adj row-sums
            ],
        ),
        compiler_params=pltpu.CompilerParams(
            dimension_semantics=("parallel", "arbitrary"),
            vmem_limit_bytes=vmem_limit),
    )(adj_p, rhs_p, w_p, b_p)

    return out_p[:N, :F_out]


def get_symmetrically_normalized_adjacency_dense(edge_index, num_nodes, padded_shape=None):
    """Plain-JAX glue: dense D^{-1/2} A D^{-1/2} from COO edge_index [2, E].

    If `padded_shape` is given, scatter directly into the padded (N_r, N_c) zero
    array so the kernel wrapper does not need an extra full-matrix copy."""
    row, col = edge_index[0], edge_index[1]
    edge_weight = jnp.ones((edge_index.shape[1],), dtype=jnp.float32)
    deg = jnp.zeros((num_nodes,), dtype=jnp.float32).at[col].add(edge_weight)
    deg_inv_sqrt = deg ** -0.5
    deg_inv_sqrt = jnp.where(jnp.isinf(deg_inv_sqrt), 0.0, deg_inv_sqrt)
    dad = deg_inv_sqrt[row] * edge_weight * deg_inv_sqrt[col]
    shape = padded_shape if padded_shape is not None else (num_nodes, num_nodes)
    # densify the sparse COO tensor (duplicates coalesce by summation, like torch sparse)
    return jnp.zeros(shape, dtype=jnp.float32).at[row, col].add(dad)


def reference_forward(adj, x, mask, weight, bias):
    x = jnp.where(jnp.isnan(x), 0.0, x)
    num = (adj @ jnp.ones_like(x)) * (adj @ (mask * x))
    den = adj @ mask
    ratio = jnp.nan_to_num(num / den)
    return ratio @ weight + bias


if __name__ == "__main__":
    N = 256          # num_nodes
    F_IN = 32        # in_features
    F_OUT = 64       # out_features
    E = 1024         # num edges

    key = jax.random.PRNGKey(0)
    k_edge, k_x, k_mask, k_w, k_b, k_nan = jax.random.split(key, 6)

    # synthetic graph — build the dense normalized adjacency directly at its
    # kernel-padded shape (avoids a second full-matrix copy inside the wrapper).
    edge_index = jax.random.randint(k_edge, (2, E), 0, N, dtype=jnp.int32)
    tile_n, tile_k, N_r, N_c = _plan_tiles(N)
    adj_p = get_symmetrically_normalized_adjacency_dense(edge_index, N, padded_shape=(N_r, N_c))

    # node features with a few NaNs (module zeroes them out)
    x = jax.random.normal(k_x, (N, F_IN), dtype=jnp.float32)
    nan_mask = jax.random.bernoulli(k_nan, 0.05, (N, F_IN))
    x = jnp.where(nan_mask, jnp.nan, x)

    # binary feature-observation mask
    mask = jax.random.bernoulli(k_mask, 0.7, (N, F_IN)).astype(jnp.float32)

    # deterministic Linear(in_features, out_features) params (weight stored as [F_in, F_out])
    bound = 1.0 / jnp.sqrt(F_IN)
    weight = jax.random.uniform(k_w, (F_IN, F_OUT), jnp.float32, -bound, bound)
    bias = jax.random.uniform(k_b, (F_OUT,), jnp.float32, -bound, bound)

    out = pagnn_forward(adj_p, x, mask, weight, bias, tile_n=tile_n, tile_k=tile_k)
    out = jax.block_until_ready(out)

    ref = reference_forward(adj_p[:N, :N], x, mask, weight, bias)
    assert out.shape == (N, F_OUT)
    assert jnp.allclose(out, ref, atol=1e-4, rtol=1e-4), "mismatch vs pure-JAX reference"

    print("KERNEL_OK")
</pallas_src>

<mosaic_0001>
module attributes {stable_mosaic.version = 11 : i64} {
  func.func @pagnn_kernel(%arg0: i32, %arg1: i32, %arg2: memref<128x256xf32, #tpu.memory_space<vmem>>, %arg3: memref<256x128xf32, #tpu.memory_space<vmem>>, %arg4: memref<64x128xf32, #tpu.memory_space<vmem>>, %arg5: memref<1x128xf32, #tpu.memory_space<vmem>>, %arg6: memref<128x128xf32, #tpu.memory_space<vmem>>, %arg7: memref<128x128xf32, #tpu.memory_space<vmem>>, %arg8: memref<128x1xf32, #tpu.memory_space<vmem>>) attributes {dimension_semantics = [#tpu.dimension_semantics<parallel>, #tpu.dimension_semantics<arbitrary>], iteration_bounds = array<i64: 2, 1>, scalar_prefetch = 0 : i64, scratch_operands = 2 : i64, tpu.core_type = #tpu.core_type<tc>, window_params = [{transform_indices = @transform_0, window_bounds = array<i64: 128, 256>}, {transform_indices = @transform_1, window_bounds = array<i64: 256, 128>}, {pipeline_mode = #tpu.pipeline_mode<synchronous>, transform_indices = @transform_2, window_bounds = array<i64: 64, 128>}, {pipeline_mode = #tpu.pipeline_mode<synchronous>, transform_indices = @transform_3, window_bounds = array<i64: 1, 128>}, {transform_indices = @transform_4, window_bounds = array<i64: 128, 128>}]} {
    %c0_i32 = arith.constant 0 : i32
    %0 = arith.cmpi eq, %arg1, %c0_i32 : i32
    %1 = arith.extui %0 : i1 to i32
    %c0_i32_0 = arith.constant 0 : i32
    %2 = arith.cmpi ne, %1, %c0_i32_0 : i32
    scf.if %2 {
      %cst_15 = arith.constant 0.000000e+00 : f32
      %17 = vector.broadcast %cst_15 : f32 to vector<128x128xf32>
      %c0_16 = arith.constant 0 : index
      %c0_17 = arith.constant 0 : index
      %18 = vector.load %arg7[%c0_16, %c0_17] : memref<128x128xf32, #tpu.memory_space<vmem>>, vector<128x128xf32>
      tpu.vector_store %arg7[%c0_16, %c0_17], %17 {strides = array<i32>} : memref<128x128xf32, #tpu.memory_space<vmem>>, vector<128x128xf32>,
      %cst_18 = arith.constant 0.000000e+00 : f32
      %19 = vector.broadcast %cst_18 : f32 to vector<128x1xf32>
      %c0_19 = arith.constant 0 : index
      %c0_20 = arith.constant 0 : index
      %20 = vector.load %arg8[%c0_19, %c0_20] : memref<128x1xf32, #tpu.memory_space<vmem>>, vector<128x1xf32>
      tpu.vector_store %arg8[%c0_19, %c0_20], %19 {strides = array<i32>} : memref<128x1xf32, #tpu.memory_space<vmem>>, vector<128x1xf32>,
    } else {
    }
    %c0 = arith.constant 0 : index
    %c0_1 = arith.constant 0 : index
    %3 = vector.load %arg2[%c0, %c0_1] : memref<128x256xf32, #tpu.memory_space<vmem>>, vector<128x256xf32>
    %c0_2 = arith.constant 0 : index
    %c0_3 = arith.constant 0 : index
    %4 = vector.load %arg7[%c0_2, %c0_3] : memref<128x128xf32, #tpu.memory_space<vmem>>, vector<128x128xf32>
    %c0_4 = arith.constant 0 : index
    %c0_5 = arith.constant 0 : index
    %5 = vector.load %arg3[%c0_4, %c0_5] : memref<256x128xf32, #tpu.memory_space<vmem>>, vector<256x128xf32>
    %cst = arith.constant dense<0.000000e+00> : vector<128x128xf32>
    %6 = tpu.matmul %3, %5, %cst {dimension_numbers = #tpu.dot_dimension_numbers<[1], [0], [0], [1], [0, 0, 1, 1], [], []>} : vector<128x256xf32>, vector<256x128xf32>, vector<128x128xf32> -> vector<128x128xf32>
    %7 = arith.addf %4, %6 : vector<128x128xf32>
    %c0_6 = arith.constant 0 : index
    %c0_7 = arith.constant 0 : index
    %8 = vector.load %arg7[%c0_6, %c0_7] : memref<128x128xf32, #tpu.memory_space<vmem>>, vector<128x128xf32>
    tpu.vector_store %arg7[%c0_6, %c0_7], %7 {strides = array<i32>} : memref<128x128xf32, #tpu.memory_space<vmem>>, vector<128x128xf32>,
    %c0_8 = arith.constant 0 : index
    %c0_9 = arith.constant 0 : index
    %9 = vector.load %arg8[%c0_8, %c0_9] : memref<128x1xf32, #tpu.memory_space<vmem>>, vector<128x1xf32>
    %cst_10 = arith.constant dense<0.000000e+00> : vector<128xf32>
    %10 = vector.multi_reduction <add>, %3, %cst_10 [1] : vector<128x256xf32> to vector<128xf32>
    %11 = vector.shape_cast %10 : vector<128xf32> to vector<128x1xf32>
    %12 = arith.addf %9, %11 : vector<128x1xf32>
    %c0_11 = arith.constant 0 : index
    %c0_12 = arith.constant 0 : index
    %13 = vector.load %arg8[%c0_11, %c0_12] : memref<128x1xf32, #tpu.memory_space<vmem>>, vector<128x1xf32>
    tpu.vector_store %arg8[%c0_11, %c0_12], %12 {strides = array<i32>} : memref<128x1xf32, #tpu.memory_space<vmem>>, vector<128x1xf32>,
    %c0_i32_13 = arith.constant 0 : i32
    %14 = arith.cmpi eq, %arg1, %c0_i32_13 : i32
    %15 = arith.extui %14 : i1 to i32
    %c0_i32_14 = arith.constant 0 : i32
    %16 = arith.cmpi ne, %15, %c0_i32_14 : i32
    scf.if %16 {
      %c0_15 = arith.constant 0 : index
      %c0_16 = arith.constant 0 : index
      %17 = vector.load %arg7[%c0_15, %c0_16] : memref<128x128xf32, #tpu.memory_space<vmem>>, vector<128x128xf32>
      %c0_17 = arith.constant 0 : index
      %c0_18 = arith.constant 0 : index
      %18 = vector.load %arg8[%c0_17, %c0_18] : memref<128x1xf32, #tpu.memory_space<vmem>>, vector<128x1xf32>
      %19 = vector.extract_strided_slice %17 {offsets = [0, 0], sizes = [128, 64], strides = [1, 1]} : vector<128x128xf32> to vector<128x64xf32>
      %20 = vector.broadcast %18 : vector<128x1xf32> to vector<128x64xf32>
      %21 = arith.mulf %20, %19 : vector<128x64xf32>
      %22 = vector.extract_strided_slice %17 {offsets = [0, 64], sizes = [128, 64], strides = [1, 1]} : vector<128x128xf32> to vector<128x64xf32>
      %23 = arith.divf %21, %22 : vector<128x64xf32>
      %24 = arith.cmpf one, %23, %23 : vector<128x64xf32>
      %cst_19 = arith.constant 0.000000e+00 : f32
      %25 = vector.broadcast %cst_19 : f32 to vector<128x64xf32>
      %26 = arith.select %24, %25, %23 : vector<128x64xi1>, vector<128x64xf32>
      %cst_20 = arith.constant 0x7F800000 : f32
      %27 = vector.broadcast %cst_20 : f32 to vector<128x64xf32>
      %28 = arith.cmpf oeq, %26, %27 : vector<128x64xf32>
      %cst_21 = arith.constant 3.40282347E+38 : f32
      %29 = vector.broadcast %cst_21 : f32 to vector<128x64xf32>
      %30 = arith.select %28, %29, %26 : vector<128x64xi1>, vector<128x64xf32>
      %cst_22 = arith.constant 0xFF800000 : f32
      %31 = vector.broadcast %cst_22 : f32 to vector<128x64xf32>
      %32 = arith.cmpf oeq, %30, %31 : vector<128x64xf32>
      %cst_23 = arith.constant -3.40282347E+38 : f32
      %33 = vector.broadcast %cst_23 : f32 to vector<128x64xf32>
      %34 = arith.select %32, %33, %30 : vector<128x64xi1>, vector<128x64xf32>
      %c0_24 = arith.constant 0 : index
      %c0_25 = arith.constant 0 : index
      %35 = vector.load %arg4[%c0_24, %c0_25] : memref<64x128xf32, #tpu.memory_space<vmem>>, vector<64x128xf32>
      %cst_26 = arith.constant dense<0.000000e+00> : vector<128x128xf32>
      %36 = tpu.matmul %34, %35, %cst_26 {dimension_numbers = #tpu.dot_dimension_numbers<[1], [0], [0], [1], [0, 0, 1, 1], [], []>} : vector<128x64xf32>, vector<64x128xf32>, vector<128x128xf32> -> vector<128x128xf32>
      %c0_27 = arith.constant 0 : index
      %c0_28 = arith.constant 0 : index
      %37 = vector.load %arg5[%c0_27, %c0_28] : memref<1x128xf32, #tpu.memory_space<vmem>>, vector<1x128xf32>
      %38 = vector.broadcast %37 : vector<1x128xf32> to vector<128x128xf32>
      %39 = arith.addf %36, %38 : vector<128x128xf32>
      %c0_29 = arith.constant 0 : index
      %c0_30 = arith.constant 0 : index
      %40 = vector.load %arg6[%c0_29, %c0_30] : memref<128x128xf32, #tpu.memory_space<vmem>>, vector<128x128xf32>
      tpu.vector_store %arg6[%c0_29, %c0_30], %39 {strides = array<i32>} : memref<128x128xf32, #tpu.memory_space<vmem>>, vector<128x128xf32>,
    } else {
    }
    return
  }
  func.func @transform_0(%arg0: i32, %arg1: i32) -> (i32, i32) {
    %c0_i32 = arith.constant 0 : i32
    return %arg0, %arg1 : i32, i32
  }
  func.func @transform_1(%arg0: i32, %arg1: i32) -> (i32, i32) {
    %c0_i32 = arith.constant 0 : i32
    %c0_i32_0 = arith.constant 0 : i32
    return %arg1, %c0_i32 : i32, i32
  }
  func.func @transform_2(%arg0: i32, %arg1: i32) -> (i32, i32) {
    %c0_i32 = arith.constant 0 : i32
    %c0_i32_0 = arith.constant 0 : i32
    %c0_i32_1 = arith.constant 0 : i32
    return %c0_i32, %c0_i32_0 : i32, i32
  }
  func.func @transform_3(%arg0: i32, %arg1: i32) -> (i32, i32) {
    %c0_i32 = arith.constant 0 : i32
    %c0_i32_0 = arith.constant 0 : i32
    %c0_i32_1 = arith.constant 0 : i32
    return %c0_i32, %c0_i32_0 : i32, i32
  }
  func.func @transform_4(%arg0: i32, %arg1: i32) -> (i32, i32) {
    %c0_i32 = arith.constant 0 : i32
    %c0_i32_0 = arith.constant 0 : i32
    return %arg0, %c0_i32 : i32, i32
  }
}

</mosaic_0001>

<bundles_post_ra>
// kernel: pagnn_forward.1
= control target key start
LH: loop header
LB: loop body
LE: loop exit
PB: predicated region body
PF: predicated region fallthrough
CT: control target
= control target key end

     0   :  { %s1631_s15 = smov 0   ;;  %s1633_s16 = smov 0   ;;  %s2099_s0 = inlined_call_operand.vmem [shape: f32[256,256], index: 0, kind: input, shape index: {}]   ;;  %s2100_s1 = inlined_call_operand.vmem [shape: f32[256,128], index: 1, kind: input, shape index: {}]   ;;  %s2101_s2 = inlined_call_operand.vmem [shape: f32[64,128], index: 2, kind: input, shape index: {}]   ;;  %s2102_s3 = inlined_call_operand.vmem [shape: f32[1,128], index: 3, kind: input, shape index: {}]   ;;  %s2103_s4 = inlined_call_operand.vmem [shape: f32[256,128], index: 4, kind: output, shape index: {}]  }
   0x1   :  { %s1635_s17 = smov 0  }
   0x2 LB: > { %s26_s18 = sadd.s32 1, %s1597_s16  ;;  %p1284_p0 = scmp.ge.s32.totalorder %s1601_s17, 1  ;;  %s1601_s17 = sphi %s1635_s17, %s14_s17   ;;  %s1597_s16 = sphi %s1633_s16, %s2106_s16   ;;  %s1593_s15 = sphi %s1631_s15, %s2105_s15  }
   0x3   : > { %p28_p1 = scmp.ge.s32.totalorder %s26_s18, 2  ;;  %p194_p2 = scmp.lt.s32.totalorder %s1601_s17, 3 }
   0x5   : > { %s2108_s18 = smov (%p28_p1, %s26_s18), 0  ;;  %p195_p3 = pnand %p1284_p0, %p194_p2 }
   0x6   : > { %v355_v0 = vld [vmem:[%s2100_s1 + $0x80] sm:$0xff] (!%p195_p3)  ;;  %v356_v1 = vld [vmem:[%s2100_s1 + $0x88] sm:$0xff] (!%p195_p3)  ;;  %s1285_s25 = sshll.u32 (!%p195_p3), %s1593_s15, 4  ;;  %vm274_vm0 = vcmask (!%p195_p3), 7168   ;;  %v357_v5 = vld [vmem:[%s2100_s1 + $0x90] sm:$0xff] (!%p195_p3)  ;;  %v1603_v7 = vmov (!%p195_p3), 0.0  }
   0x7   : > { %198 = sbr.rel (%p195_p3) target bundleno = 671 (0x29f), region = 36  ;;  %v339_v2 = vld [vmem:[%s2100_s1] sm:$0xff] (!%p195_p3)  ;;  %v1454_v3 = vpack.c.bf16 (!%p195_p3), %v356_v1, %v355_v0  ;;  %v340_v4 = vld [vmem:[%s2100_s1 + $0x8] sm:$0xff] (!%p195_p3)  ;;  %v358_v6 = vld [vmem:[%s2100_s1 + $0x98] sm:$0xff] (!%p195_p3)  ;;  %p1672_p4 = scmp.lt.s32.totalorder (!%p195_p3), %s1285_s25, 31  ;;  %277 = vst.msk [vmem:[#allocation3 + $0x10] sm:$0xff] (!%p195_p3), %vm274_vm0, %v1603_v7 }
   0x8   : > { %275 = vst.msk [vmem:[#allocation3] sm:$0xff] (!%p195_p3), %vm274_vm0, %v1603_v7  ;;  %276 = vst.msk [vmem:[#allocation3 + $0x8] sm:$0xff] (!%p195_p3), %vm274_vm0, %v1603_v7  ;;  %v1456_v8 = vpack.c.bf16 (!%p195_p3), %v340_v4, %v339_v2  ;;  %v1458_v9 = vpack.c.bf16 (!%p195_p3), %v358_v6, %v357_v5  ;;  %v341_v10 = vld [vmem:[%s2100_s1 + $0x10] sm:$0xff] (!%p195_p3)  ;;  %v342_v11 = vld [vmem:[%s2100_s1 + $0x18] sm:$0xff] (!%p195_p3)  ;;  %s1605_s6 = smov (!%p195_p3), 64   ;;  %vm983_vm3 = vcmask (!%p195_p3), 523264  }
   0x9   : > { %278 = vst.msk [vmem:[#allocation3 + $0x18] sm:$0xff] (!%p195_p3), %vm274_vm0, %v1603_v7  ;;  %279 = vst.msk [vmem:[#allocation3 + $0x20] sm:$0xff] (!%p195_p3), %vm274_vm0, %v1603_v7  ;;  %v359_v12 = vld [vmem:[%s2100_s1 + $0xa0] sm:$0xff] (!%p195_p3)  ;;  %1455 = vmatprep.subr.bf16.mxu0 (!%p195_p3), %v1454_v3  ;;  %1502 = vmatprep.subr.bf16.mxu1 (!%p195_p3), %v1454_v3  ;;  %v360_v13 = vld [vmem:[%s2100_s1 + $0xa8] sm:$0xff] (!%p195_p3)  ;;  %v1460_v14 = vpack.c.bf16 (!%p195_p3), %v342_v11, %v341_v10 }
   0xa   : > { %280 = vst.msk [vmem:[#allocation3 + $0x28] sm:$0xff] (!%p195_p3), %vm274_vm0, %v1603_v7  ;;  %281 = vst.msk [vmem:[#allocation3 + $0x30] sm:$0xff] (!%p195_p3), %vm274_vm0, %v1603_v7  ;;  %1457 = vmatpush3.bf16.msra.mxu0 (!%p195_p3), %v1456_v8  ;;  %1510 = vmatpush3.bf16.msra.mxu1 (!%p195_p3), %v1456_v8  ;;  %v1462_v15 = vpack.c.bf16 (!%p195_p3), %v360_v13, %v359_v12  ;;  %v343_v16 = vld [vmem:[%s2100_s1 + $0x20] sm:$0xff] (!%p195_p3)  ;;  %v344_v17 = vld [vmem:[%s2100_s1 + $0x28] sm:$0xff] (!%p195_p3) }
   0xb   : > { %282 = vst.msk [vmem:[#allocation3 + $0x38] sm:$0xff] (!%p195_p3), %vm274_vm0, %v1603_v7  ;;  %283 = vst.msk [vmem:[#allocation3 + $0x40] sm:$0xff] (!%p195_p3), %vm274_vm0, %v1603_v7  ;;  %1459 = vmatprep.subr.bf16.mxu0 (!%p195_p3), %v1458_v9  ;;  %1503 = vmatprep.subr.bf16.mxu1 (!%p195_p3), %v1458_v9  ;;  %v361_v18 = vld [vmem:[%s2100_s1 + $0xb0] sm:$0xff] (!%p195_p3)  ;;  %v362_v19 = vld [vmem:[%s2100_s1 + $0xb8] sm:$0xff] (!%p195_p3)  ;;  %v1464_v26 = vpack.c.bf16 (!%p195_p3), %v344_v17, %v343_v16 }
   0xc   : > { %284 = vst.msk [vmem:[#allocation3 + $0x48] sm:$0xff] (!%p195_p3), %vm274_vm0, %v1603_v7  ;;  %285 = vst.msk [vmem:[#allocation3 + $0x50] sm:$0xff] (!%p195_p3), %vm274_vm0, %v1603_v7  ;;  %v345_v23 = vld [vmem:[%s2100_s1 + $0x30] sm:$0xff] (!%p195_p3)  ;;  %v1466_v32 = vpack.c.bf16 (!%p195_p3), %v362_v19, %v361_v18  ;;  %v346_v33 = vld [vmem:[%s2100_s1 + $0x38] sm:$0xff] (!%p195_p3) }
   0xd   : > { %286 = vst.msk [vmem:[#allocation3 + $0x58] sm:$0xff] (!%p195_p3), %vm274_vm0, %v1603_v7  ;;  %287 = vst.msk [vmem:[#allocation3 + $0x60] sm:$0xff] (!%p195_p3), %vm274_vm0, %v1603_v7  ;;  %v363_v35 = vld [vmem:[%s2100_s1 + $0xc0] sm:$0xff] (!%p195_p3)  ;;  %v364_v36 = vld [vmem:[%s2100_s1 + $0xc8] sm:$0xff] (!%p195_p3)  ;;  %v1468_v40 = vpack.c.bf16 (!%p195_p3), %v346_v33, %v345_v23 }
   0xe   : > { %288 = vst.msk [vmem:[#allocation3 + $0x68] sm:$0xff] %vm274_vm0, %v1603_v7  ;;  %289 = vst.msk [vmem:[#allocation3 + $0x70] sm:$0xff] %vm274_vm0, %v1603_v7  ;;  %s2110_s25 = smov (!%p1672_p4, %s1285_s25), 31  ;;  %1461 = vmatpush3.bf16.msra.mxu0 %v1460_v14  ;;  %1511 = vmatpush3.bf16.msra.mxu1 %v1460_v14  ;;  %v1470_v43 = vpack.c.bf16 %v364_v36, %v363_v35  ;;  %v347_v44 = vld [vmem:[%s2100_s1 + $0x40] sm:$0xff]  ;;  %v348_v45 = vld [vmem:[%s2100_s1 + $0x48] sm:$0xff] }
   0xf   : > { %290 = vst.msk [vmem:[#allocation3 + $0x78] sm:$0xff] %vm274_vm0, %v1603_v7  ;;  %s1309_s19 = sshll.u32 %s2110_s25, 4  ;;  %1463 = vmatprep.subr.bf16.mxu0 %v1462_v15  ;;  %1504 = vmatprep.subr.bf16.mxu1 %v1462_v15  ;;  %v365_v47 = vld [vmem:[%s2100_s1 + $0xd0] sm:$0xff]  ;;  %v366_v48 = vld [vmem:[%s2100_s1 + $0xd8] sm:$0xff]  ;;  %v1472_v52 = vpack.c.bf16 %v348_v45, %v347_v44  ;;  %v367_v59 = vld [vmem:[%s2100_s1 + $0xe0] sm:$0xff] }
  0x10   : > { %s1720_s26 = scalar_lea.vmem %s2099_s0, %s1309_s19  ;;  %v1474_v55 = vpack.c.bf16 %v366_v48, %v365_v47  ;;  %v349_v56 = vld [vmem:[%s2100_s1 + $0x50] sm:$0xff]  ;;  %v350_v57 = vld [vmem:[%s2100_s1 + $0x58] sm:$0xff]  ;;  %v368_v60 = vld [vmem:[%s2100_s1 + $0xe8] sm:$0xff]  ;;  %s1289_s19 = sshll.u32 %s2110_s25, 3 }
  0x11   : > { %v1729_v20 = vld [vmem:[%s1720_s26 + $0x20] sm:$0xff]  ;;  %v1732_v21 = vld [vmem:[%s1720_s26 + $0x28] sm:$0xff]  ;;  %v1744_v27 = vld [vmem:[%s1720_s26 + $0x30] sm:$0xff]  ;;  %v1476_v1 = vpack.c.bf16 %v350_v57, %v349_v56  ;;  %v1478_v4 = vpack.c.bf16 %v368_v60, %v367_v59 }
  0x12   : > { %v1735_v22 = vld [vmem:[%s1720_s26] sm:$0xff]  ;;  %v570_v24 = vadd.f32 %v1732_v21, %v1729_v20  ;;  %v292_v25 = vld [vmem:[%s1720_s26 + $0x8] sm:$0xff]  ;;  %v1747_v28 = vld [vmem:[%s1720_s26 + $0x38] sm:$0xff]  ;;  %1465 = vmatpush3.bf16.msra.mxu0 %v1464_v26  ;;  %1512 = vmatpush3.bf16.msra.mxu1 %v1464_v26 }
  0x13   : > { %v564_v29 = vadd.f32 %v292_v25, %v1735_v22  ;;  %v1751_v30 = vld [vmem:[%s1720_s26 + $0x10] sm:$0xff]  ;;  %v1754_v31 = vld [vmem:[%s1720_s26 + $0x18] sm:$0xff]  ;;  %v573_v34 = vadd.f32 %v1747_v28, %v1744_v27  ;;  %435 = vmatprep.mubr.f32.mxu0 %v292_v25  ;;  %v1776_v41 = vld [vmem:[%s1720_s26 + $0x40] sm:$0xff]  ;;  %1467 = vmatprep.subr.bf16.mxu0 %v1466_v32 }
  0x14   : > { %571 = vadd.xlane.f32.xlu1 %v570_v24  ;;  %v567_v37 = vadd.f32 %v1754_v31, %v1751_v30  ;;  %v1770_v38 = vld [vmem:[%s1720_s26 + $0x50] sm:$0xff]  ;;  %v1773_v39 = vld [vmem:[%s1720_s26 + $0x58] sm:$0xff]  ;;  %v1779_v42 = vld [vmem:[%s1720_s26 + $0x48] sm:$0xff]  ;;  %1505 = vmatprep.subr.bf16.mxu1 %v1466_v32 }
  0x15   : > { %565 = vadd.xlane.f32.xlu0 %v564_v29  ;;  %v579_v46 = vadd.f32 %v1773_v39, %v1770_v38  ;;  %v1796_v49 = vld [vmem:[%s1720_s26 + $0x70] sm:$0xff]  ;;  %v1799_v50 = vld [vmem:[%s1720_s26 + $0x78] sm:$0xff]  ;;  %v576_v51 = vadd.f32 %v1779_v42, %v1776_v41  ;;  %v1804_v53 = vld [vmem:[%s1720_s26 + $0x60] sm:$0xff] }
  0x16   : > { %1469 = vmatpush3.bf16.msra.mxu0 %v1468_v40  ;;  %1513 = vmatpush3.bf16.msra.mxu1 %v1468_v40  ;;  %v1807_v54 = vld [vmem:[%s1720_s26 + $0x68] sm:$0xff]  ;;  %v585_v58 = vadd.f32 %v1799_v50, %v1796_v49  ;;  %v1825_v62 = vld [vmem:[%s1720_s26 + $0x90] sm:$0xff]  ;;  %v1828_v63 = vld [vmem:[%s1720_s26 + $0x98] sm:$0xff] }
  0x17   : > { %1471 = vmatprep.subr.bf16.mxu0 %v1470_v43  ;;  %1506 = vmatprep.subr.bf16.mxu1 %v1470_v43  ;;  %v316_v61 = vld [vmem:[%s1720_s26 + $0xc8] sm:$0xff]  ;;  %v582_v0 = vadd.f32 %v1807_v54, %v1804_v53  ;;  %v1833_v2 = vld [vmem:[%s1720_s26 + $0x80] sm:$0xff]  ;;  %v591_v7 = vadd.f32 %v1828_v63, %v1825_v62  ;;  %v369_v8 = vld [vmem:[%s2100_s1 + $0xf0] sm:$0xff] }
  0x18   : > { %574 = vadd.xlane.f32.xlu1 %v573_v34  ;;  %495 = vmatprep.mubr.f32.mxu1 %v316_v61  ;;  %v1836_v3 = vld [vmem:[%s1720_s26 + $0x88] sm:$0xff]  ;;  %v351_v5 = vld [vmem:[%s2100_s1 + $0x60] sm:$0xff]  ;;  %v370_v9 = vld [vmem:[%s2100_s1 + $0xf8] sm:$0xff] }
  0x19   : > { %568 = vadd.xlane.f32.xlu0 %v567_v37  ;;  %v352_v6 = vld [vmem:[%s2100_s1 + $0x68] sm:$0xff]  ;;  %v1853_v10 = vld [vmem:[%s1720_s26 + $0xb0] sm:$0xff]  ;;  %v1856_v11 = vld [vmem:[%s1720_s26 + $0xb8] sm:$0xff]  ;;  %v588_v12 = vadd.f32 %v1836_v3, %v1833_v2  ;;  %v1482_v16 = vpack.c.bf16 %v370_v9, %v369_v8  ;;  %v1604_v37 = vmov 0  }
  0x1a   : > { %1473 = vmatpush3.bf16.msra.mxu0 %v1472_v52  ;;  %1514 = vmatpush3.bf16.msra.mxu1 %v1472_v52  ;;  %v1480_v13 = vpack.c.bf16 %v352_v6, %v351_v5  ;;  %v1861_v14 = vld [vmem:[%s1720_s26 + $0xa0] sm:$0xff]  ;;  %v312_v15 = vld [vmem:[%s1720_s26 + $0xa8] sm:$0xff]  ;;  %v353_v17 = vld [vmem:[%s2100_s1 + $0x70] sm:$0xff]  ;;  %v597_v19 = vadd.f32 %v1856_v11, %v1853_v10 }
  0x1b   : > { %1475 = vmatprep.subr.bf16.mxu0 %v1474_v55  ;;  %1507 = vmatprep.subr.bf16.mxu1 %v1474_v55  ;;  %v354_v18 = vld [vmem:[%s2100_s1 + $0x78] sm:$0xff]  ;;  %v594_v23 = vadd.f32 %v312_v15, %v1861_v14  ;;  %v317_v26 = vld [vmem:[%s1720_s26 + $0xd0] sm:$0xff]  ;;  %v315_v32 = vld [vmem:[%s1720_s26 + $0xc0] sm:$0xff] }
  0x1c   : > { %580 = vadd.xlane.f32.xlu1 %v579_v46  ;;  %v1484_v24 = vpack.c.bf16 %v354_v18, %v353_v17  ;;  %v318_v25 = vld [vmem:[%s1720_s26 + $0xd8] sm:$0xff]  ;;  %v321_v34 = vld [vmem:[%s1720_s26 + $0xf0] sm:$0xff]  ;;  %v600_v35 = vadd.f32 %v316_v61, %v315_v32  ;;  %1546 = vset.pattern.permute.xlu0 %v1604_v37  ;;  %v320_v40 = vld [vmem:[%s1720_s26 + $0xe8] sm:$0xff] }
  0x1d   : > { %577 = vadd.xlane.f32.xlu0 %v576_v51  ;;  %v603_v29 = vadd.f32 %v318_v25, %v317_v26  ;;  %v322_v33 = vld [vmem:[%s1720_s26 + $0xf8] sm:$0xff]  ;;  %v319_v43 = vld [vmem:[%s1720_s26 + $0xe0] sm:$0xff]  ;;  %1545 = vset.pattern.permute.xlu1 %v1604_v37  ;;  %v553_v46 = vld [vmem:[#allocation3 + $0x28] sm:$0xff]  ;;  %s2072_s26 = scalar_lea.vmem %s2103_s4, %s1289_s19 }
  0x1e   : > { %1477 = vmatpush3.bf16.msra.mxu0 %v1476_v1  ;;  %1515 = vmatpush3.bf16.msra.mxu1 %v1476_v1  ;;  %v609_v36 = vadd.f32 %v322_v33, %v321_v34  ;;  %v606_v44 = vadd.f32 %v320_v40, %v319_v43  ;;  %v552_v47 = vld [vmem:[#allocation3 + $0x20] sm:$0xff]  ;;  %v555_v52 = vld [vmem:[#allocation3 + $0x38] sm:$0xff]  ;;  %v554_v55 = vld [vmem:[#allocation3 + $0x30] sm:$0xff] }
  0x1f   : > { %1479 = vmatprep.subr.bf16.mxu0 %v1478_v4  ;;  %1508 = vmatprep.subr.bf16.mxu1 %v1478_v4  ;;  %v557_v59 = vld [vmem:[#allocation3 + $0x48] sm:$0xff]  ;;  %v559_v4 = vld [vmem:[#allocation3 + $0x58] sm:$0xff]  ;;  %v558_v6 = vld [vmem:[#allocation3 + $0x50] sm:$0xff] }
  0x20   : > { %586 = vadd.xlane.f32.xlu1 %v585_v58  ;;  %v560_v17 = vld [vmem:[#allocation3 + $0x60] sm:$0xff] }
  0x21   : > { %583 = vadd.xlane.f32.xlu0 %v582_v0  ;;  %v968_v37 = vld [vmem:[%s2101_s2] sm:$0xff] }
  0x22   : > { %1481 = vmatpush3.bf16.msra.mxu0 %v1480_v13  ;;  %1516 = vmatpush3.bf16.msra.mxu1 %v1480_v13  ;;  %v561_v13 = vld [vmem:[#allocation3 + $0x68] sm:$0xff] }
  0x23   : > { %1483 = vmatprep.subr.bf16.mxu0 %v1482_v16  ;;  %1509 = vmatprep.subr.bf16.mxu1 %v1482_v16 }
  0x24   : > { %592 = vadd.xlane.f32.xlu1 %v591_v7 }
  0x25   : > { %589 = vadd.xlane.f32.xlu0 %v588_v12 }
  0x26   : > { %1485 = vmatpush3.bf16.msra.mxu0 %v1484_v24  ;;  %1517 = vmatpush3.bf16.msra.mxu1 %v1484_v24 }
  0x28   : > { %598 = vadd.xlane.f32.xlu1 %v597_v19  ;;  %v563_v19 = vld [vmem:[#allocation3 + $0x78] sm:$0xff] }
  0x29   : > { %595 = vadd.xlane.f32.xlu0 %v594_v23  ;;  %436 = vmatmul.mubr.f32.vlgmr.msra.gmra.mrb[0].mxu0 %v1735_v22 }
  0x2a   : > { %496 = vmatmul.mubr.f32.vlgmr.msra.gmra.mrb[0].mxu1 %v315_v32  ;;  %440 = vmatprep.mubr.f32.mxu0 %v1754_v31  ;;  %v551_v31 = vld [vmem:[#allocation3 + $0x18] sm:$0xff]  ;;  %v562_v32 = vld [vmem:[#allocation3 + $0x70] sm:$0xff] }
  0x2b   : > { %500 = vmatprep.mubr.f32.mxu1 %v318_v25 }
  0x2c   : > { %604 = vadd.xlane.f32.xlu1 %v603_v29 }
  0x2d   : > { %601 = vadd.xlane.f32.xlu0 %v600_v35  ;;  %441 = vmatmul.mubr.f32.gmra.mrb[2].mxu0 %v1751_v30 }
  0x2e   : > { %501 = vmatmul.mubr.f32.gmra.mrb[2].mxu1 %v317_v26  ;;  %445 = vmatprep.mubr.f32.mxu0 %v1732_v21  ;;  %v548_v21 = vld [vmem:[#allocation3] sm:$0xff] }
  0x2f   : > { %505 = vmatprep.mubr.f32.mxu1 %v320_v40  ;;  %v969_v40 = vld [vmem:[%s2101_s2 + $0x8] sm:$0xff] }
  0x30   : > { %610 = vadd.xlane.f32.xlu1 %v609_v36 }
  0x31   : > { %607 = vadd.xlane.f32.xlu0 %v606_v44  ;;  %446 = vmatmul.mubr.f32.gmra.mrb[4].mxu0 %v1729_v20  ;;  %v550_v20 = vld [vmem:[#allocation3 + $0x10] sm:$0xff] }
  0x32   : > { %506 = vmatmul.mubr.f32.gmra.mrb[4].mxu1 %v319_v43  ;;  %450 = vmatprep.mubr.f32.mxu0 %v1747_v28  ;;  %v1486_v43 = vpack.c.bf16 %v969_v40, %v968_v37 }
  0x33   : > { %510 = vmatprep.mubr.f32.mxu1 %v322_v33 }
  0x34   : > { %1487 = vmatprep.subr.bf16.mxu1 %v1486_v43 }
  0x35   : > { %451 = vmatmul.mubr.f32.gmra.mrb[6].mxu0 %v1744_v27  ;;  %1489 = vmatpush3.bf16.msra.mxu1 %v1486_v43 }
  0x36   : > { %511 = vmatmul.mubr.f32.gmra.mrb[6].mxu1 %v321_v34  ;;  %455 = vmatprep.mubr.f32.mxu0 %v1779_v42 }
  0x39   : > { %456 = vmatmul.mubr.f32.gmra.mrb[8].mxu0 %v1776_v41 }
  0x3a   : > { %460 = vmatprep.mubr.f32.mxu0 %v1773_v39 }
  0x3d   : > { %461 = vmatmul.mubr.f32.gmra.mrb[10].mxu0 %v1770_v38  ;;  %v549_v38 = vld [vmem:[#allocation3 + $0x8] sm:$0xff] }
  0x3e   : > { %465 = vmatprep.mubr.f32.mxu0 %v1807_v54 }
  0x41   : > { %466 = vmatmul.mubr.f32.gmra.mrb[12].mxu0 %v1804_v53 }
  0x42   : > { %470 = vmatprep.mubr.f32.mxu0 %v1799_v50 }
  0x45   : > { %471 = vmatmul.mubr.f32.gmra.mrb[14].mxu0 %v1796_v49 }
  0x46   : > { %475 = vmatprep.mubr.f32.mxu0 %v1836_v3 }
  0x49   : > { %476 = vmatmul.mubr.f32.gmra.mrb[16].mxu0 %v1833_v2 }
  0x4a   : > { %480 = vmatprep.mubr.f32.mxu0 %v1828_v63 }
  0x4d   : > { %481 = vmatmul.mubr.f32.gmra.mrb[18].mxu0 %v1825_v62  ;;  %v556_v62 = vld [vmem:[#allocation3 + $0x40] sm:$0xff] }
  0x4e   : > { %485 = vmatprep.mubr.f32.mxu0 %v312_v15 }
  0x51   : > { %486 = vmatmul.mubr.f32.gmra.mrb[20].mxu0 %v1861_v14 }
  0x52   : > { %490 = vmatprep.mubr.f32.mxu0 %v1856_v11 }
  0x55   : > { %491 = vmatmul.mubr.f32.gmra.mrb[22].mxu0 %v1853_v10 }
  0xa1   : > { %v572_v22 = vpop.xlane.xlu1 %571 }
  0xa2   : > { %v614_v27 = vadd.f32 %v572_v22, %v550_v20  ;;  %v566_v28 = vpop.xlane.xlu0 %565  ;;  %v971_v22 = vld [vmem:[%s2101_s2 + $0x18] sm:$0xff] }
  0xa3   : > { %v612_v30 = vadd.f32 %v566_v28, %v548_v21  ;;  %v970_v21 = vld [vmem:[%s2101_s2 + $0x10] sm:$0xff] }
  0xa4   : > { %631 = vst.msk [vmem:[#allocation3 + $0x10] sm:$0xff] %vm274_vm0, %v614_v27 }
  0xa5   : > { %629 = vst.msk [vmem:[#allocation3] sm:$0xff] %vm274_vm0, %v612_v30  ;;  %v575_v39 = vpop.xlane.xlu1 %574  ;;  %v1490_v30 = vpack.c.bf16 %v971_v22, %v970_v21 }
  0xa6   : > { %v615_v41 = vadd.f32 %v575_v39, %v551_v31  ;;  %v569_v42 = vpop.xlane.xlu0 %568 }
  0xa7   : > { %v613_v45 = vadd.f32 %v569_v42, %v549_v38  ;;  %1491 = vmatprep.subr.bf16.mxu1 %v1490_v30  ;;  %v972_v42 = vld [vmem:[%s2101_s2 + $0x20] sm:$0xff] }
  0xa8   : > { %632 = vst.msk [vmem:[#allocation3 + $0x18] sm:$0xff] %vm274_vm0, %v615_v41  ;;  %1493 = vmatpush3.bf16.msra.mxu1 %v1490_v30 }
  0xa9   : > { %630 = vst.msk [vmem:[#allocation3 + $0x8] sm:$0xff] %vm274_vm0, %v613_v45  ;;  %v581_v48 = vpop.xlane.xlu1 %580  ;;  %v973_v45 = vld [vmem:[%s2101_s2 + $0x28] sm:$0xff] }
  0xaa   : > { %v617_v49 = vadd.f32 %v581_v48, %v553_v46  ;;  %v578_v50 = vpop.xlane.xlu0 %577  ;;  %v1494_v48 = vpack.c.bf16 %v973_v45, %v972_v42 }
  0xab   : > { %v666_v51 = vld [vmem:[#allocation3 + $0x10] sm:$0xff]  ;;  %v616_v53 = vadd.f32 %v578_v50, %v552_v47 }
  0xac   : > { %634 = vst.msk [vmem:[#allocation3 + $0x28] sm:$0xff] %vm274_vm0, %v617_v49  ;;  %692 = vperm.xlu0 %1546, %v666_v51   ;;  %v664_v54 = vld [vmem:[#allocation3] sm:$0xff]  ;;  %1495 = vmatprep.subr.bf16.mxu1 %v1494_v48  ;;  %v974_v51 = vld [vmem:[%s2101_s2 + $0x30] sm:$0xff] }
  0xad   : > { %682 = vperm.xlu1 %1545, %v664_v54   ;;  %v587_v56 = vpop.xlane.xlu1 %586  ;;  %633 = vst.msk [vmem:[#allocation3 + $0x20] sm:$0xff] %vm274_vm0, %v616_v53  ;;  %1497 = vmatpush3.bf16.msra.mxu1 %v1494_v48 }
  0xae   : > { %v619_v57 = vadd.f32 %v587_v56, %v555_v52  ;;  %v584_v58 = vpop.xlane.xlu0 %583  ;;  %v975_v52 = vld [vmem:[%s2101_s2 + $0x38] sm:$0xff] }
  0xaf   : > { %v618_v60 = vadd.f32 %v584_v58, %v554_v55  ;;  %v667_v1 = vld [vmem:[#allocation3 + $0x18] sm:$0xff]  ;;  %v1498_v55 = vpack.c.bf16 %v975_v52, %v974_v51 }
  0xb0   : > { %636 = vst.msk [vmem:[#allocation3 + $0x38] sm:$0xff] %vm274_vm0, %v619_v57  ;;  %v665_v61 = vld [vmem:[#allocation3 + $0x8] sm:$0xff] }
  0xb1   : > { %687 = vperm.xlu1 %1545, %v665_v61   ;;  %v593_v63 = vpop.xlane.xlu1 %592  ;;  %635 = vst.msk [vmem:[#allocation3 + $0x30] sm:$0xff] %vm274_vm0, %v618_v60  ;;  %1499 = vmatprep.subr.bf16.mxu1 %v1498_v55 }
  0xb2   : > { %v621_v0 = vadd.f32 %v593_v63, %v557_v59  ;;  %v590_v2 = vpop.xlane.xlu0 %589  ;;  %1501 = vmatpush3.bf16.msra.mxu1 %v1498_v55 }
  0xb3   : > { %v669_v3 = vld [vmem:[#allocation3 + $0x28] sm:$0xff]  ;;  %v620_v5 = vadd.f32 %v590_v2, %v556_v62 }
  0xb4   : > { %638 = vst.msk [vmem:[#allocation3 + $0x48] sm:$0xff] %vm274_vm0, %v621_v0  ;;  %707 = vperm.xlu0 %1546, %v669_v3   ;;  %v668_v9 = vld [vmem:[#allocation3 + $0x20] sm:$0xff] }
  0xb5   : > { %697 = vperm.xlu1 %1545, %v667_v1   ;;  %v599_v7 = vpop.xlane.xlu1 %598  ;;  %637 = vst.msk [vmem:[#allocation3 + $0x40] sm:$0xff] %vm274_vm0, %v620_v5 }
  0xb6   : > { %v623_v8 = vadd.f32 %v599_v7, %v559_v4  ;;  %v596_v10 = vpop.xlane.xlu0 %595 }
  0xb7   : > { %v671_v11 = vld [vmem:[#allocation3 + $0x38] sm:$0xff]  ;;  %v622_v12 = vadd.f32 %v596_v10, %v558_v6 }
  0xb8   : > { %640 = vst.msk [vmem:[#allocation3 + $0x58] sm:$0xff] %vm274_vm0, %v623_v8  ;;  %717 = vperm.xlu0 %1546, %v671_v11   ;;  %v670_v15 = vld [vmem:[#allocation3 + $0x30] sm:$0xff] }
  0xb9   : > { %702 = vperm.xlu1 %1545, %v668_v9   ;;  %639 = vst.msk [vmem:[#allocation3 + $0x50] sm:$0xff] %vm274_vm0, %v622_v12  ;;  %v605_v14 = vpop.xlane.xlu1 %604 }
  0xba   : > { %v625_v16 = vadd.f32 %v605_v14, %v561_v13  ;;  %v602_v23 = vpop.xlane.xlu0 %601 }
  0xbb   : > { %v673_v18 = vld [vmem:[#allocation3 + $0x48] sm:$0xff]  ;;  %v624_v24 = vadd.f32 %v602_v23, %v560_v17 }
  0xbc   : > { %727 = vperm.xlu0 %1546, %v673_v18   ;;  %642 = vst.msk [vmem:[#allocation3 + $0x68] sm:$0xff] %vm274_vm0, %v625_v16  ;;  %v672_v26 = vld [vmem:[#allocation3 + $0x40] sm:$0xff] }
  0xbd   : > { %712 = vperm.xlu1 %1545, %v670_v15   ;;  %v611_v25 = vpop.xlane.xlu1 %610  ;;  %641 = vst.msk [vmem:[#allocation3 + $0x60] sm:$0xff] %vm274_vm0, %v624_v24 }
  0xbe   : > { %v627_v29 = vadd.f32 %v611_v25, %v563_v19  ;;  %v608_v34 = vpop.xlane.xlu0 %607 }
  0xbf   : > { %v675_v33 = vld [vmem:[#allocation3 + $0x58] sm:$0xff]  ;;  %v626_v35 = vadd.f32 %v608_v34, %v562_v32 }
  0xc0   : > { %737 = vperm.xlu0 %1546, %v675_v33   ;;  %644 = vst.msk [vmem:[#allocation3 + $0x78] sm:$0xff] %vm274_vm0, %v627_v29  ;;  %v674_v36 = vld [vmem:[#allocation3 + $0x50] sm:$0xff] }
  0xc1   : > { %722 = vperm.xlu1 %1545, %v672_v26   ;;  %643 = vst.msk [vmem:[#allocation3 + $0x70] sm:$0xff] %vm274_vm0, %v626_v35 }
  0xc3   : > { %v677_v34 = vld [vmem:[#allocation3 + $0x68] sm:$0xff] }
  0xc4   : > { %v676_v32 = vld [vmem:[#allocation3 + $0x60] sm:$0xff] }
  0xc5   : > { %732 = vperm.xlu1 %1545, %v674_v36  }
  0xc7   : > { %v679_v36 = vld [vmem:[#allocation3 + $0x78] sm:$0xff] }
  0xc8   : > { %v678_v35 = vld [vmem:[#allocation3 + $0x70] sm:$0xff] }
  0xfc   : > { %v1342_v44 = vpop.f32.mrb[0].mxu0 }
  0xfd   : > { %v1378_v20 = vpop.f32.mrb[0].mxu1  ;;  %v1343_v27 = vpop.f32.mrb[1].mxu0 }
  0xfe   : > { %v1379_v28 = vpop.f32.mrb[1].mxu1  ;;  %v1930_v31 = vadd.f32 %v1343_v27, %v1342_v44 }
  0xff   : > { %v1932_v38 = vadd.f32 %v1379_v28, %v1378_v20 }
 0x100   : > { %v1345_v41 = vpop.f32.mrb[2].mxu0  ;;  %792 = vrot.lane.b32.xlu0 %v1930_v31, %s1605_s6 }
 0x101   : > { %v1381_v39 = vpop.f32.mrb[2].mxu1  ;;  %816 = vrot.lane.b32.xlu1 %v1932_v38, %s1605_s6  ;;  %v1346_v46 = vpop.f32.mrb[3].mxu0 }
 0x102   : > { %v1382_v47 = vpop.f32.mrb[3].mxu1  ;;  %v1944_v49 = vadd.f32 %v1346_v46, %v1345_v41 }
 0x103   : > { %v1946_v50 = vadd.f32 %v1382_v47, %v1381_v39 }
 0x104   : > { %v1348_v53 = vpop.f32.mrb[4].mxu0 }
 0x105   : > { %794 = vrot.lane.b32.xlu1 %v1944_v49, %s1605_s6  ;;  %818 = vrot.lane.b32.xlu0 %v1946_v50, %s1605_s6  ;;  %v1384_v54 = vpop.f32.mrb[4].mxu1  ;;  %v1349_v56 = vpop.f32.mrb[5].mxu0 }
 0x106   : > { %v1385_v57 = vpop.f32.mrb[5].mxu1  ;;  %v1958_v58 = vadd.f32 %v1349_v56, %v1348_v53 }
 0x107   : > { %v1960_v59 = vadd.f32 %v1385_v57, %v1384_v54 }
 0x108   : > { %v1351_v60 = vpop.f32.mrb[6].mxu0 }
 0x109   : > { %796 = vrot.lane.b32.xlu0 %v1958_v58, %s1605_s6  ;;  %v1387_v61 = vpop.f32.mrb[6].mxu1  ;;  %v1352_v62 = vpop.f32.mrb[7].mxu0 }
 0x10a   : > { %v1388_v63 = vpop.f32.mrb[7].mxu1  ;;  %v1964_v0 = vadd.f32 %v1352_v62, %v1351_v60 }
 0x10b   : > { %v1966_v1 = vadd.f32 %v1388_v63, %v1387_v61 }
 0x10c   : > { %v1354_v2 = vpop.f32.mrb[8].mxu0  ;;  %798 = vrot.lane.b32.xlu1 %v1964_v0, %s1605_s6 }
 0x10d   : > { %v1355_v3 = vpop.f32.mrb[9].mxu0 }
 0x10e   : > { %v1970_v4 = vadd.f32 %v1355_v3, %v1354_v2 }
 0x110   : > { %v1357_v5 = vpop.f32.mrb[10].mxu0  ;;  %800 = vrot.lane.b32.xlu1 %v1970_v4, %s1605_s6 }
 0x111   : > { %v1358_v6 = vpop.f32.mrb[11].mxu0 }
 0x112   : > { %v1974_v7 = vadd.f32 %v1358_v6, %v1357_v5 }
 0x114   : > { %v1360_v8 = vpop.f32.mrb[12].mxu0  ;;  %802 = vrot.lane.b32.xlu0 %v1974_v7, %s1605_s6 }
 0x115   : > { %v1361_v9 = vpop.f32.mrb[13].mxu0 }
 0x116   : > { %v1978_v10 = vadd.f32 %v1361_v9, %v1360_v8 }
 0x118   : > { %v1363_v11 = vpop.f32.mrb[14].mxu0  ;;  %804 = vrot.lane.b32.xlu1 %v1978_v10, %s1605_s6 }
 0x119   : > { %v1364_v12 = vpop.f32.mrb[15].mxu0 }
 0x11a   : > { %v1982_v13 = vadd.f32 %v1364_v12, %v1363_v11 }
 0x11c   : > { %v1366_v14 = vpop.f32.mrb[16].mxu0  ;;  %806 = vrot.lane.b32.xlu0 %v1982_v13, %s1605_s6 }
 0x11d   : > { %v1367_v15 = vpop.f32.mrb[17].mxu0 }
 0x11e   : > { %v1986_v16 = vadd.f32 %v1367_v15, %v1366_v14 }
 0x120   : > { %v1369_v17 = vpop.f32.mrb[18].mxu0  ;;  %808 = vrot.lane.b32.xlu1 %v1986_v16, %s1605_s6 }
 0x121   : > { %v1370_v18 = vpop.f32.mrb[19].mxu0 }
 0x122   : > { %v1990_v19 = vadd.f32 %v1370_v18, %v1369_v17 }
 0x124   : > { %v1372_v23 = vpop.f32.mrb[20].mxu0  ;;  %810 = vrot.lane.b32.xlu0 %v1990_v19, %s1605_s6 }
 0x125   : > { %v1373_v24 = vpop.f32.mrb[21].mxu0 }
 0x126   : > { %v1994_v25 = vadd.f32 %v1373_v24, %v1372_v23 }
 0x128   : > { %v1375_v26 = vpop.f32.mrb[22].mxu0  ;;  %812 = vrot.lane.b32.xlu1 %v1994_v25, %s1605_s6 }
 0x129   : > { %v1376_v29 = vpop.f32.mrb[23].mxu0 }
 0x12a   : > { %v1998_v33 = vadd.f32 %v1376_v29, %v1375_v26 }
 0x12b   : > { %v693_v44 = vpop.permute.xlu0 %692 }
 0x12c   : > { %742 = vperm.xlu1 %1545, %v676_v32   ;;  %814 = vrot.lane.b32.xlu0 %v1998_v33, %s1605_s6  ;;  %v683_v37 = vpop.permute.xlu1 %682  ;;  %v762_v62 = vmul.f32 %v1958_v58, %v693_v44 }
 0x12d   : > { %v760_v51 = vmul.f32 %v1930_v31, %v683_v37 }
 0x130   : > { %820 = vrot.lane.b32.xlu1 %v1960_v59, %s1605_s6  ;;  %747 = vperm.xlu0 %1546, %v677_v34   ;;  %v688_v40 = vpop.permute.xlu1 %687 }
 0x131   : > { %v761_v55 = vmul.f32 %v1944_v49, %v688_v40 }
 0x133   : > { %v2006_v20 = vpop.permute.xlu0 %707 }
 0x134   : > { %752 = vperm.xlu1 %1545, %v678_v35   ;;  %822 = vrot.lane.b32.xlu0 %v1966_v1, %s1605_s6  ;;  %v698_v43 = vpop.permute.xlu1 %697  ;;  %v765_v32 = vmul.f32 %v1974_v7, %v2006_v20 }
 0x135   : > { %v763_v8 = vmul.f32 %v1964_v0, %v698_v43 }
 0x137   : > { %v2008_v22 = vpop.permute.xlu0 %717 }
 0x138   : > { %757 = vperm.xlu0 %1546, %v679_v36   ;;  %v703_v21 = vpop.permute.xlu1 %702 }
 0x139   : > { %v764_v17 = vmul.f32 %v1970_v4, %v703_v21 }
 0x13b   : > { %v2012_v28 = vpop.permute.xlu0 %727 }
 0x13c   : > { %v2010_v27 = vpop.permute.xlu1 %712 }
 0x13d   : > { %v766_v43 = vmul.f32 %v1978_v10, %v2010_v27 }
 0x13f   : > { %v2016_v39 = vpop.permute.xlu0 %737 }
 0x140   : > { %v2014_v30 = vpop.permute.xlu1 %722 }
 0x144   : > { %v2018_v41 = vpop.permute.xlu1 %732 }
 0x172   : > { %v793_v45 = vpop.permute.xlu0 %792 }
 0x173   : > { %v2020_v42 = vpop.permute.xlu1 %816  ;;  %1547 = vrcp.f32 %v793_v45 }
 0x177   : > { %v795_v46 = vpop.permute.xlu1 %794  ;;  %v2022_v47 = vpop.permute.xlu0 %818 }
 0x178   : > { %1549 = vrcp.f32 %v795_v46 }
 0x17b   : > { %v797_v48 = vpop.permute.xlu0 %796 }
 0x17c   : > { %1551 = vrcp.f32 %v797_v48  ;;  %v767_v48 = vmul.f32 %v1982_v13, %v2008_v22 }
 0x17d   : > { %v1548_v52 = vpop.eup %1547 }
 0x17e   : > { %v799_v53 = vpop.permute.xlu1 %798  ;;  %v841_v54 = vmul.f32 %v1548_v52, %v760_v51 }
 0x17f   : > { %1553 = vrcp.f32 %v799_v53 }
 0x180   : > { %vm872_vm1 = vcmp.ne.f32.partialorder %v841_v54, %v841_v54 }
 0x181   : > { %v888_v61 = vsel %vm872_vm1, 0.0, %v841_v54 }
 0x182   : > { %v1550_v56 = vpop.eup %1549  ;;  %v801_v60 = vpop.permute.xlu1 %800  ;;  %vm904_vm2 = vcmp.eq.f32.partialorder %v888_v61, inf }
 0x183   : > { %v843_v57 = vmul.f32 %v1550_v56, %v761_v55  ;;  %1555 = vrcp.f32 %v801_v60  ;;  %v920_v63 = vsel %vm904_vm2, 3.4028235e+38, %v888_v61  ;;  %v768_v55 = vmul.f32 %v1986_v16, %v2014_v30 }
 0x184   : > { %vm936_vm5 = vcmp.eq.f32.partialorder %v920_v63, -inf }
 0x185   : > { %vm873_vm4 = vcmp.ne.f32.partialorder %v843_v57, %v843_v57  ;;  %v952_v5 = vsel %vm936_vm5, -3.4028235e+38, %v920_v63 }
 0x186   : > { %v1552_v2 = vpop.eup %1551  ;;  %v889_v31 = vsel %vm873_vm4, 0.0, %v843_v57  ;;  %v803_v3 = vpop.permute.xlu0 %802  ;;  %1430 = vmatprep.mubr.msk.f32.mxu1 %vm983_vm3, %v952_v5 }
 0x187   : > { %vm905_vm6 = vcmp.eq.f32.partialorder %v889_v31, inf  ;;  %v845_v6 = vmul.f32 %v1552_v2, %v762_v62  ;;  %1557 = vrcp.f32 %v803_v3  ;;  %v769_v62 = vmul.f32 %v1990_v19, %v2012_v28 }
 0x188   : > { %v921_v49 = vsel %vm905_vm6, 3.4028235e+38, %v889_v31  ;;  %v770_v3 = vmul.f32 %v1994_v25, %v2018_v41 }
 0x189   : > { %vm937_vm7 = vcmp.eq.f32.partialorder %v921_v49, -inf  ;;  %vm874_vm8 = vcmp.ne.f32.partialorder %v845_v6, %v845_v6  ;;  %v1554_v9 = vpop.eup %1553 }
 0x18a   : > { %v953_v58 = vsel %vm937_vm7, -3.4028235e+38, %v921_v49  ;;  %v890_v11 = vsel %vm874_vm8, 0.0, %v845_v6  ;;  %v805_v12 = vpop.permute.xlu1 %804  ;;  %v847_v14 = vmul.f32 %v1554_v9, %v763_v8  ;;  %v771_v8 = vmul.f32 %v1998_v33, %v2016_v39 }
 0x18b   : > { %1431 = vmatmul.mubr.msk.f32.vlgmr.msra.gmra.mrb[8].mxu1 %vm983_vm3, %v953_v58  ;;  %vm906_vm9 = vcmp.eq.f32.partialorder %v890_v11, inf  ;;  %1559 = vrcp.f32 %v805_v12 }
 0x18c   : > { %v922_v15 = vsel %vm906_vm9, 3.4028235e+38, %v890_v11  ;;  %vm875_vm11 = vcmp.ne.f32.partialorder %v847_v14, %v847_v14 }
 0x18d   : > { %vm938_vm10 = vcmp.eq.f32.partialorder %v922_v15, -inf  ;;  %v1556_v18 = vpop.eup %1555  ;;  %v891_v24 = vsel %vm875_vm11, 0.0, %v847_v14 }
 0x18e   : > { %v954_v23 = vsel %vm938_vm10, -3.4028235e+38, %v922_v15  ;;  %v807_v0 = vpop.permute.xlu0 %806  ;;  %vm907_vm12 = vcmp.eq.f32.partialorder %v891_v24, inf  ;;  %v849_v26 = vmul.f32 %v1556_v18, %v764_v17 }
 0x18f   : > { %1433 = vmatprep.mubr.msk.f32.mxu1 %vm983_vm3, %v954_v23  ;;  %1561 = vrcp.f32 %v807_v0  ;;  %v923_v29 = vsel %vm907_vm12, 3.4028235e+38, %v891_v24 }
 0x190   : > { %vm939_vm13 = vcmp.eq.f32.partialorder %v923_v29, -inf  ;;  %vm876_vm14 = vcmp.ne.f32.partialorder %v849_v26, %v849_v26 }
 0x191   : > { %v1558_v34 = vpop.eup %1557  ;;  %v955_v35 = vsel %vm939_vm13, -3.4028235e+38, %v923_v29  ;;  %v892_v4 = vsel %vm876_vm14, 0.0, %v849_v26 }
 0x192   : > { %v809_v36 = vpop.permute.xlu1 %808  ;;  %1434 = vmatmul.mubr.msk.f32.gmra.mrb[10].mxu1 %vm983_vm3, %v955_v35  ;;  %vm908_vm15 = vcmp.eq.f32.partialorder %v892_v4, inf  ;;  %v851_v37 = vmul.f32 %v1558_v34, %v765_v32 }
 0x193   : > { %1563 = vrcp.f32 %v809_v36  ;;  %v924_v40 = vsel %vm908_vm15, 3.4028235e+38, %v892_v4 }
 0x194   : > { %vm940_vm0 = vcmp.eq.f32.partialorder %v924_v40, -inf  ;;  %vm877_vm1 = vcmp.ne.f32.partialorder %v851_v37, %v851_v37 }
 0x195   : > { %v1560_v44 = vpop.eup %1559  ;;  %v956_v21 = vsel %vm940_vm0, -3.4028235e+38, %v924_v40  ;;  %v893_v7 = vsel %vm877_vm1, 0.0, %v851_v37 }
 0x196   : > { %v811_v20 = vpop.permute.xlu0 %810  ;;  %1436 = vmatprep.mubr.msk.f32.mxu1 %vm983_vm3, %v956_v21  ;;  %vm909_vm2 = vcmp.eq.f32.partialorder %v893_v7, inf  ;;  %v853_v45 = vmul.f32 %v1560_v44, %v766_v43 }
 0x197   : > { %1565 = vrcp.f32 %v811_v20  ;;  %v925_v46 = vsel %vm909_vm2, 3.4028235e+38, %v893_v7 }
 0x198   : > { %vm941_vm4 = vcmp.eq.f32.partialorder %v925_v46, -inf  ;;  %vm878_vm5 = vcmp.ne.f32.partialorder %v853_v45, %v853_v45 }
 0x199   : > { %v1562_v51 = vpop.eup %1561  ;;  %v957_v52 = vsel %vm941_vm4, -3.4028235e+38, %v925_v46  ;;  %v894_v10 = vsel %vm878_vm5, 0.0, %v853_v45 }
 0x19a   : > { %v813_v27 = vpop.permute.xlu1 %812  ;;  %1437 = vmatmul.mubr.msk.f32.gmra.mrb[12].mxu1 %vm983_vm3, %v957_v52  ;;  %vm910_vm6 = vcmp.eq.f32.partialorder %v894_v10, inf  ;;  %v855_v53 = vmul.f32 %v1562_v51, %v767_v48 }
 0x19b   : > { %1567 = vrcp.f32 %v813_v27  ;;  %v926_v54 = vsel %vm910_vm6, 3.4028235e+38, %v894_v10 }
 0x19c   : > { %vm942_vm7 = vcmp.eq.f32.partialorder %v926_v54, -inf  ;;  %vm879_vm8 = vcmp.ne.f32.partialorder %v855_v53, %v855_v53 }
 0x19d   : > { %v1564_v56 = vpop.eup %1563  ;;  %v958_v57 = vsel %vm942_vm7, -3.4028235e+38, %v926_v54  ;;  %v895_v13 = vsel %vm879_vm8, 0.0, %v855_v53 }
 0x19e   : > { %v815_v22 = vpop.permute.xlu0 %814  ;;  %1439 = vmatprep.mubr.msk.f32.mxu1 %vm983_vm3, %v958_v57  ;;  %vm911_vm9 = vcmp.eq.f32.partialorder %v895_v13, inf  ;;  %v857_v60 = vmul.f32 %v1564_v56, %v768_v55 }
 0x19f   : > { %1569 = vrcp.f32 %v815_v22  ;;  %v927_v61 = vsel %vm911_vm9, 3.4028235e+38, %v895_v13 }
 0x1a0   : > { %vm943_vm10 = vcmp.eq.f32.partialorder %v927_v61, -inf  ;;  %vm880_vm11 = vcmp.ne.f32.partialorder %v857_v60, %v857_v60  ;;  %1571 = vrcp.f32 %v2020_v42 }
 0x1a1   : > { %v1566_v63 = vpop.eup %1565  ;;  %v959_v2 = vsel %vm943_vm10, -3.4028235e+38, %v927_v61  ;;  %v896_v16 = vsel %vm880_vm11, 0.0, %v857_v60  ;;  %1573 = vrcp.f32 %v2022_v47 }
 0x1a2   : > { %1440 = vmatmul.mubr.msk.f32.gmra.mrb[14].mxu1 %vm983_vm3, %v959_v2  ;;  %vm912_vm12 = vcmp.eq.f32.partialorder %v896_v16, inf  ;;  %v859_v30 = vmul.f32 %v1566_v63, %v769_v62 }
 0x1a3   : > { %v928_v31 = vsel %vm912_vm12, 3.4028235e+38, %v896_v16 }
 0x1a4   : > { %vm944_vm13 = vcmp.eq.f32.partialorder %v928_v31, -inf  ;;  %vm881_vm14 = vcmp.ne.f32.partialorder %v859_v30, %v859_v30 }
 0x1a5   : > { %v1568_v5 = vpop.eup %1567  ;;  %v960_v6 = vsel %vm944_vm13, -3.4028235e+38, %v928_v31  ;;  %v897_v19 = vsel %vm881_vm14, 0.0, %v859_v30 }
 0x1a6   : > { %1442 = vmatprep.mubr.msk.f32.mxu1 %vm983_vm3, %v960_v6  ;;  %vm913_vm15 = vcmp.eq.f32.partialorder %v897_v19, inf  ;;  %v861_v28 = vmul.f32 %v1568_v5, %v770_v3 }
 0x1a7   : > { %v929_v49 = vsel %vm913_vm15, 3.4028235e+38, %v897_v19 }
 0x1a8   : > { %vm945_vm0 = vcmp.eq.f32.partialorder %v929_v49, -inf  ;;  %vm882_vm1 = vcmp.ne.f32.partialorder %v861_v28, %v861_v28 }
 0x1a9   : > { %v1570_v42 = vpop.eup %1569  ;;  %v961_v9 = vsel %vm945_vm0, -3.4028235e+38, %v929_v49  ;;  %v898_v25 = vsel %vm882_vm1, 0.0, %v861_v28 }
 0x1aa   : > { %1443 = vmatmul.mubr.msk.f32.gmra.mrb[16].mxu1 %vm983_vm3, %v961_v9  ;;  %vm914_vm2 = vcmp.eq.f32.partialorder %v898_v25, inf  ;;  %v863_v41 = vmul.f32 %v1570_v42, %v771_v8  ;;  %v1572_v47 = vpop.eup %1571 }
 0x1ab   : > { %v743_v58 = vpop.permute.xlu1 %742  ;;  %v930_v11 = vsel %vm914_vm2, 3.4028235e+38, %v898_v25  ;;  %v1574_v24 = vpop.eup %1573 }
 0x1ac   : > { %v772_v12 = vmul.f32 %v1932_v38, %v743_v58  ;;  %vm946_vm4 = vcmp.eq.f32.partialorder %v930_v11, -inf  ;;  %vm883_vm5 = vcmp.ne.f32.partialorder %v863_v41, %v863_v41 }
 0x1ad   : > { %v962_v14 = vsel %vm946_vm4, -3.4028235e+38, %v930_v11  ;;  %v899_v15 = vsel %vm883_vm5, 0.0, %v863_v41 }
 0x1ae   : > { %v865_v17 = vmul.f32 %v1572_v47, %v772_v12  ;;  %1445 = vmatprep.mubr.msk.f32.mxu1 %vm983_vm3, %v962_v14  ;;  %vm915_vm6 = vcmp.eq.f32.partialorder %v899_v15, inf }
 0x1af   : > { %v821_v33 = vpop.permute.xlu1 %820  ;;  %v748_v39 = vpop.permute.xlu0 %747  ;;  %v931_v18 = vsel %vm915_vm6, 3.4028235e+38, %v899_v15 }
 0x1b0   : > { %vm884_vm7 = vcmp.ne.f32.partialorder %v865_v17, %v865_v17  ;;  %1575 = vrcp.f32 %v821_v33  ;;  %v773_v23 = vmul.f32 %v1946_v50, %v748_v39  ;;  %vm947_vm8 = vcmp.eq.f32.partialorder %v931_v18, -inf }
 0x1b1   : > { %v900_v0 = vsel %vm884_vm7, 0.0, %v865_v17  ;;  %v963_v38 = vsel %vm947_vm8, -3.4028235e+38, %v931_v18 }
 0x1b2   : > { %v867_v26 = vmul.f32 %v1574_v24, %v773_v23  ;;  %1446 = vmatmul.mubr.msk.f32.gmra.mrb[18].mxu1 %vm983_vm3, %v963_v38  ;;  %vm916_vm9 = vcmp.eq.f32.partialorder %v900_v0, inf }
 0x1b3   : > { %v823_v29 = vpop.permute.xlu0 %822  ;;  %v932_v32 = vsel %vm916_vm9, 3.4028235e+38, %v900_v0  ;;  %v753_v4 = vpop.permute.xlu1 %752 }
 0x1b4   : > { %vm885_vm10 = vcmp.ne.f32.partialorder %v867_v26, %v867_v26  ;;  %1577 = vrcp.f32 %v823_v29  ;;  %vm948_vm11 = vcmp.eq.f32.partialorder %v932_v32, -inf  ;;  %v774_v36 = vmul.f32 %v1960_v59, %v753_v4 }
 0x1b5   : > { %v901_v34 = vsel %vm885_vm10, 0.0, %v867_v26  ;;  %v964_v35 = vsel %vm948_vm11, -3.4028235e+38, %v932_v32 }
 0x1b6   : > { %1448 = vmatprep.mubr.msk.f32.mxu1 %vm983_vm3, %v964_v35  ;;  %vm917_vm12 = vcmp.eq.f32.partialorder %v901_v34, inf }
 0x1b7   : > { %v933_v50 = vsel %vm917_vm12, 3.4028235e+38, %v901_v34  ;;  %v758_v43 = vpop.permute.xlu0 %757 }
 0x1b8   : > { %vm949_vm13 = vcmp.eq.f32.partialorder %v933_v50, -inf  ;;  %v775_v21 = vmul.f32 %v1966_v1, %v758_v43  ;;  %v1290_v1 = vld [vmem:[%s2102_s3] ss:$0 sm:$0xff] }
 0x1b9   : > { %v965_v37 = vsel %vm949_vm13, -3.4028235e+38, %v933_v50 }
 0x1ba   : > { %v1576_v40 = vpop.eup %1575  ;;  %1449 = vmatmul.mubr.msk.f32.gmra.mrb[20].mxu1 %vm983_vm3, %v965_v37 }
 0x1bb   : > { %v869_v44 = vmul.f32 %v1576_v40, %v774_v36 }
 0x1bd   : > { %vm886_vm14 = vcmp.ne.f32.partialorder %v869_v44, %v869_v44 }
 0x1be   : > { %v1578_v7 = vpop.eup %1577  ;;  %v902_v20 = vsel %vm886_vm14, 0.0, %v869_v44 }
 0x1bf   : > { %v871_v45 = vmul.f32 %v1578_v7, %v775_v21  ;;  %vm918_vm15 = vcmp.eq.f32.partialorder %v902_v20, inf }
 0x1c0   : > { %v934_v46 = vsel %vm918_vm15, 3.4028235e+38, %v902_v20 }
 0x1c1   : > { %vm887_vm0 = vcmp.ne.f32.partialorder %v871_v45, %v871_v45  ;;  %vm950_vm1 = vcmp.eq.f32.partialorder %v934_v46, -inf }
 0x1c2   : > { %v903_v48 = vsel %vm887_vm0, 0.0, %v871_v45  ;;  %v966_v51 = vsel %vm950_vm1, -3.4028235e+38, %v934_v46 }
 0x1c3   : > { %1451 = vmatprep.mubr.msk.f32.mxu1 %vm983_vm3, %v966_v51  ;;  %vm919_vm2 = vcmp.eq.f32.partialorder %v903_v48, inf }
 0x1c4   : > { %v935_v59 = vsel %vm919_vm2, 3.4028235e+38, %v903_v48 }
 0x1c5   : > { %vm951_vm4 = vcmp.eq.f32.partialorder %v935_v59, -inf }
 0x1c6   : > { %v967_v52 = vsel %vm951_vm4, -3.4028235e+38, %v935_v59 }
 0x1c7   : > { %1452 = vmatmul.mubr.msk.f32.gmra.mrb[22].mxu1 %vm983_vm3, %v967_v52 }
 0x25e   : > { %v1432_v10 = vpop.f32.mrb[8].mxu1 }
 0x25f   : > { %v1104_v27 = vadd.f32 %v1432_v10, %v1290_v1  ;;  %v1098_v53 = vpop.f32.mrb[9].mxu1 }
 0x260   : > { %v1099_v54 = vadd.f32 %v1290_v1, %v1098_v53 }
 0x261   : > { %1178 = vst [vmem:[%s2072_s26 + $0x8] sm:$0xff] %v1104_v27 }
 0x262   : > { %1177 = vst [vmem:[%s2072_s26] sm:$0xff] %v1099_v54 }
 0x265   : > { %v1435_v55 = vpop.f32.mrb[10].mxu1 }
 0x266   : > { %v1114_v56 = vadd.f32 %v1435_v55, %v1290_v1  ;;  %v1108_v57 = vpop.f32.mrb[11].mxu1 }
 0x267   : > { %v1109_v13 = vadd.f32 %v1290_v1, %v1108_v57 }
 0x268   : > { %1180 = vst [vmem:[%s2072_s26 + $0x18] sm:$0xff] %v1114_v56 }
 0x269   : > { %1179 = vst [vmem:[%s2072_s26 + $0x10] sm:$0xff] %v1109_v13 }
 0x26d   : > { %v1438_v22 = vpop.f32.mrb[12].mxu1 }
 0x26e   : > { %v1124_v60 = vadd.f32 %v1438_v22, %v1290_v1  ;;  %v1118_v61 = vpop.f32.mrb[13].mxu1 }
 0x26f   : > { %v1119_v62 = vadd.f32 %v1290_v1, %v1118_v61 }
 0x270   : > { %1182 = vst [vmem:[%s2072_s26 + $0x28] sm:$0xff] %v1124_v60 }
 0x271   : > { %1181 = vst [vmem:[%s2072_s26 + $0x20] sm:$0xff] %v1119_v62 }
 0x275   : > { %v1441_v63 = vpop.f32.mrb[14].mxu1 }
 0x276   : > { %v1134_v2 = vadd.f32 %v1441_v63, %v1290_v1  ;;  %v1128_v16 = vpop.f32.mrb[15].mxu1 }
 0x277   : > { %v1129_v30 = vadd.f32 %v1290_v1, %v1128_v16 }
 0x278   : > { %1184 = vst [vmem:[%s2072_s26 + $0x38] sm:$0xff] %v1134_v2 }
 0x279   : > { %1183 = vst [vmem:[%s2072_s26 + $0x30] sm:$0xff] %v1129_v30 }
 0x27d   : > { %v1444_v31 = vpop.f32.mrb[16].mxu1 }
 0x27e   : > { %v1144_v3 = vadd.f32 %v1444_v31, %v1290_v1  ;;  %v1138_v5 = vpop.f32.mrb[17].mxu1 }
 0x27f   : > { %v1139_v6 = vadd.f32 %v1290_v1, %v1138_v5 }
 0x280   : > { %1186 = vst [vmem:[%s2072_s26 + $0x48] sm:$0xff] %v1144_v3 }
 0x281   : > { %1185 = vst [vmem:[%s2072_s26 + $0x40] sm:$0xff] %v1139_v6 }
 0x285   : > { %v1447_v19 = vpop.f32.mrb[18].mxu1 }
 0x286   : > { %v1154_v28 = vadd.f32 %v1447_v19, %v1290_v1  ;;  %v1148_v49 = vpop.f32.mrb[19].mxu1 }
 0x287   : > { %v1149_v8 = vadd.f32 %v1290_v1, %v1148_v49 }
 0x288   : > { %1188 = vst [vmem:[%s2072_s26 + $0x58] sm:$0xff] %v1154_v28 }
 0x289   : > { %1187 = vst [vmem:[%s2072_s26 + $0x50] sm:$0xff] %v1149_v8 }
 0x28d   : > { %v1450_v42 = vpop.f32.mrb[20].mxu1 }
 0x28e   : > { %v1164_v9 = vadd.f32 %v1450_v42, %v1290_v1  ;;  %v1158_v25 = vpop.f32.mrb[21].mxu1 }
 0x28f   : > { %v1159_v41 = vadd.f32 %v1290_v1, %v1158_v25 }
 0x290   : > { %1190 = vst [vmem:[%s2072_s26 + $0x68] sm:$0xff] %v1164_v9 }
 0x291   : > { %1189 = vst [vmem:[%s2072_s26 + $0x60] sm:$0xff] %v1159_v41 }
 0x29a   : > { %v1453_v58 = vpop.f32.mrb[22].mxu1 }
 0x29b   : > { %v1174_v11 = vadd.f32 %v1453_v58, %v1290_v1  ;;  %v1168_v12 = vpop.f32.mrb[23].mxu1 }
 0x29c   : > { %v1169_v47 = vadd.f32 %v1290_v1, %v1168_v12 }
 0x29d   : > { %1192 = vst [vmem:[%s2072_s26 + $0x78] sm:$0xff] %v1174_v11 }
 0x29e   : > { %1191 = vst [vmem:[%s2072_s26 + $0x70] sm:$0xff] %v1169_v47 }
 0x29f PF: > { %s14_s17 = sadd.s32 1, %s1601_s17   ;;  %s2105_s15 = smov %s1597_s16 }
 0x2a0   : > { %p11_p5 = scmp.ge.s32.totalorder %s14_s17, 4   ;;  %s2106_s16 = smov %s2108_s18 }
 0x2a2   :  { %13 = sbr.rel (!%p11_p5) target bundleno = 2 (0x2), region = 77 }

</bundles_post_ra>
